<compile_context>
chip_gen: v6e
topology: v6e:2x2x1
jax: 0.10.0
libtpu: 0.0.40
codegen_flags: <defaults>
</compile_context>

<pallas_src>
import functools

import jax
import jax.numpy as jnp
from jax.experimental import pallas as pl
from jax.experimental.pallas import tpu as pltpu


def _round_up(x, m):
    return ((x + m - 1) // m) * m


def _fused_mlp_kernel(*refs, activations):
    """refs = (x_ref, w0, b0, w1, b1, ..., o_ref).

    Runs the whole layer chain on one (TB, K) batch tile.  Matmul operands are bf16
    (MXU-native on v6e/v7x), accumulation is f32, epilogues (bias + ReLU / Sigmoid) run in
    f32 on the VPU/EUP, and the activation is narrowed back to bf16 between layers so
    intermediates stay small enough to live in vregs/VMEM without spilling.
    """
    x_ref = refs[0]
    o_ref = refs[-1]
    wb = refs[1:-1]

    h = x_ref[...].astype(jnp.bfloat16)
    acc = None
    n_layers = len(activations)
    for i, act in enumerate(activations):
        w = wb[2 * i][...]          # bf16 (fi_pad, fo_pad)
        b = wb[2 * i + 1][...]      # f32  (1, fo_pad)
        acc = jnp.dot(h, w, preferred_element_type=jnp.float32) + b
        if act == "relu":
            acc = jnp.maximum(acc, 0.0)
        elif act == "sigmoid":
            acc = jax.nn.sigmoid(acc)
        if i + 1 < n_layers:
            h = acc.astype(jnp.bfloat16)
    o_ref[...] = acc.astype(o_ref.dtype)


def _pick_batch_tile(b_pad8, tb_max):
    """Pick a batch tile (multiple of 8, <= tb_max) that prefers >=2 grid steps (so the
    'parallel' axis can use both v7x TensorCores), then minimal padding waste, then the
    largest tile (fewer per-step overheads / better MXU streaming on v6e/v7x)."""
    if b_pad8 <= 8:
        return b_pad8
    max_tb = max(8, min(tb_max, b_pad8))
    best_key, best_tb = None, 8
    for tb in range(8, max_tb + 1, 8):
        n_tiles = -(-b_pad8 // tb)
        waste = n_tiles * tb - b_pad8
        key = (n_tiles < 2, waste, -tb)
        if best_key is None or key < best_key:
            best_key, best_tb = key, tb
    return best_tb


def autoencoder_forward(padded_params, activations, x, out_features, *, tb_max=256):
    """Single fused pallas_call over the whole encoder/decoder chain, tiled over batch."""
    B, K = x.shape
    assert padded_params[0][0].shape[0] == K, "first layer in-dim must match x feature width"
    N_out = padded_params[-1][0].shape[1]     # last layer output width (kept unpadded)

    # Pad batch to sublane multiple only; pick a tile that keeps >=2 grid steps when possible.
    B_pad8 = _round_up(B, 8)
    TB = _pick_batch_tile(B_pad8, tb_max)
    B_pad = _round_up(B_pad8, TB)
    num_tiles = B_pad // TB

    x_p = x if B_pad == B else jnp.zeros((B_pad, K), x.dtype).at[:B].set(x)

    flat_inputs = [x_p]
    for w, b in padded_params:
        flat_inputs += [w, b]

    # VMEM budget: resident weights/biases (+ double-buffer worst case) + in/out batch tiles.
    weight_bytes = sum(int(w.size) * w.dtype.itemsize + int(b.size) * b.dtype.itemsize
                       for w, b in padded_params)
    tile_bytes = 2 * (TB * K + TB * N_out) * x.dtype.itemsize
    vmem_limit = int(min(128 << 20, max(32 << 20, 2 * weight_bytes + 2 * tile_bytes + (8 << 20))))

    kernel = functools.partial(_fused_mlp_kernel, activations=tuple(activations))

    def _call(const_pipeline_mode):
        const_kwargs = {} if const_pipeline_mode is None else {"pipeline_mode": const_pipeline_mode}
        in_specs = [pl.BlockSpec((TB, K), lambda i: (i, 0))]
        for w, b in padded_params:
            # Full-array blocks with a constant index_map: weights/biases are DMA'd once and
            # stay VMEM-resident across all batch-tile grid steps (single-buffered if supported).
            in_specs.append(pl.BlockSpec(w.shape, lambda i: (0, 0), **const_kwargs))
            in_specs.append(pl.BlockSpec(b.shape, lambda i: (0, 0), **const_kwargs))
        return pl.pallas_call(
            kernel,
            out_shape=jax.ShapeDtypeStruct((B_pad, N_out), x.dtype),
            grid_spec=pl.GridSpec(
                grid=(num_tiles,),
                in_specs=in_specs,
                out_specs=pl.BlockSpec((TB, N_out), lambda i: (i, 0)),
            ),
            compiler_params=pltpu.CompilerParams(
                dimension_semantics=("parallel",),   # shard batch tiles across TensorCores
                vmem_limit_bytes=vmem_limit,
            ),
        )(*flat_inputs)

    out_p = None
    if hasattr(pl, "Buffered"):
        try:
            out_p = _call(pl.Buffered(1))   # constants never change -> no double buffer
        except Exception:
            out_p = None
    if out_p is None:
        out_p = _call(None)

    # Slice batch padding back off (feature dim is already the true width).
    return out_p[:B, :out_features]


def _layer_dims(input_size, latent_size, hidden_dims):
    """(in, out, activation) list matching the PyTorch module's construct()/forward()."""
    layers = []
    in_size = input_size
    for h in hidden_dims:                       # encoder hiddens: Linear + ReLU
        layers.append((in_size, h, "relu"))
        in_size = h
    layers.append((in_size, latent_size, "none"))    # encoder head: Linear(-> latent)
    in_size = latent_size
    for h in reversed(hidden_dims):             # decoder hiddens (hidden_dims reversed)
        layers.append((in_size, h, "relu"))
        in_size = h
    layers.append((in_size, input_size, "sigmoid"))  # decoder head + Sigmoid
    return layers


def make_autoencoder_params(key, input_size, latent_size, hidden_dims, dtype=jnp.float32):
    """Unpadded params, init mimicking PyTorch's U(-1/sqrt(in), 1/sqrt(in))."""
    dims = _layer_dims(input_size, latent_size, hidden_dims)
    keys = jax.random.split(key, len(dims))
    params = []
    for k, (fi, fo, act) in zip(keys, dims):
        kw, kb = jax.random.split(k)
        bound = 1.0 / (fi ** 0.5)
        w = jax.random.uniform(kw, (fi, fo), dtype, -bound, bound)
        b = jax.random.uniform(kb, (fo,), dtype, -bound, bound)
        params.append((w, b, act))
    return params


def pad_params(params):
    """Zero-pad hidden feature dims to 128-lane multiples and cast weights to bf16.

    The first layer's input width and the last layer's output width are left unpadded so the
    kernel consumes/produces the true feature width (no host-side lane-pad round trips).
    Padding columns/rows are exact zeros, so padding never leaks into real outputs.
    """
    padded, activations = [], []
    n = len(params)
    for li, (w, b, act) in enumerate(params):
        fi, fo = w.shape
        fip = fi if li == 0 else _round_up(fi, 128)
        fop = fo if li == n - 1 else _round_up(fo, 128)
        wp = jnp.zeros((fip, fop), jnp.bfloat16).at[:fi, :fo].set(w.astype(jnp.bfloat16))
        bp = jnp.zeros((1, fop), jnp.float32).at[0, :fo].set(b.astype(jnp.float32))
        padded.append((wp, bp))
        activations.append(act)
    return padded, activations


def autoencoder_reference(params, x):
    """Pure-jnp f32 reference (unpadded) for the correctness check."""
    for w, b, act in params:
        x = x @ w + b
        if act == "relu":
            x = jnp.maximum(x, 0.0)
        elif act == "sigmoid":
            x = jax.nn.sigmoid(x)
    return x


# TODO(synk): if feature dims are scaled to >~1-2K (v7x has only 64 MiB VMEM), add a K
# reduction grid axis with a VMEM f32 accumulator (pl.when init/finalize) instead of keeping
# every full (K_pad, N_pad) weight resident; on v7x consider fp8 weights (never int8).


if __name__ == "__main__":
    key = jax.random.PRNGKey(0)
    k_params, k_x = jax.random.split(key)

    batch = 2
    input_size = 16
    latent_size = 4
    hidden_dims = [32, 8]

    params = make_autoencoder_params(k_params, input_size, latent_size, hidden_dims)
    padded_params, activations = pad_params(params)
    x = jax.random.normal(k_x, (batch, input_size), dtype=jnp.float32)

    out = autoencoder_forward(padded_params, activations, x, out_features=input_size)
    out = jax.block_until_ready(out)

    ref = autoencoder_reference(params, x)
    assert out.shape == (batch, input_size)
    # bf16 matmul operands (f32 accumulation): loosened tolerance vs. the f32 reference.
    assert jnp.allclose(out, ref, atol=2e-2, rtol=2e-2), float(jnp.max(jnp.abs(out - ref)))

    print("KERNEL_OK")
</pallas_src>

<mosaic_0001>
module attributes {stable_mosaic.version = 11 : i64} {
  func.func @_fused_mlp_kernel(%arg0: i32, %arg1: memref<8x16xf32, #tpu.memory_space<vmem>>, %arg2: memref<16x128xbf16, #tpu.memory_space<vmem>>, %arg3: memref<1x128xf32, #tpu.memory_space<vmem>>, %arg4: memref<128x128xbf16, #tpu.memory_space<vmem>>, %arg5: memref<1x128xf32, #tpu.memory_space<vmem>>, %arg6: memref<128x128xbf16, #tpu.memory_space<vmem>>, %arg7: memref<1x128xf32, #tpu.memory_space<vmem>>, %arg8: memref<128x128xbf16, #tpu.memory_space<vmem>>, %arg9: memref<1x128xf32, #tpu.memory_space<vmem>>, %arg10: memref<128x128xbf16, #tpu.memory_space<vmem>>, %arg11: memref<1x128xf32, #tpu.memory_space<vmem>>, %arg12: memref<128x16xbf16, #tpu.memory_space<vmem>>, %arg13: memref<1x16xf32, #tpu.memory_space<vmem>>, %arg14: memref<8x16xf32, #tpu.memory_space<vmem>>) attributes {dimension_semantics = [#tpu.dimension_semantics<parallel>], iteration_bounds = array<i64: 1>, scalar_prefetch = 0 : i64, scratch_operands = 0 : i64, tpu.core_type = #tpu.core_type<tc>, window_params = [{transform_indices = @transform_0, window_bounds = array<i64: 8, 16>}, {pipeline_mode = #tpu.pipeline_mode<synchronous>, transform_indices = @transform_1, window_bounds = array<i64: 16, 128>}, {pipeline_mode = #tpu.pipeline_mode<synchronous>, transform_indices = @transform_2, window_bounds = array<i64: 1, 128>}, {pipeline_mode = #tpu.pipeline_mode<synchronous>, transform_indices = @transform_3, window_bounds = array<i64: 128, 128>}, {pipeline_mode = #tpu.pipeline_mode<synchronous>, transform_indices = @transform_4, window_bounds = array<i64: 1, 128>}, {pipeline_mode = #tpu.pipeline_mode<synchronous>, transform_indices = @transform_5, window_bounds = array<i64: 128, 128>}, {pipeline_mode = #tpu.pipeline_mode<synchronous>, transform_indices = @transform_6, window_bounds = array<i64: 1, 128>}, {pipeline_mode = #tpu.pipeline_mode<synchronous>, transform_indices = @transform_7, window_bounds = array<i64: 128, 128>}, {pipeline_mode = #tpu.pipeline_mode<synchronous>, transform_indices = @transform_8, window_bounds = array<i64: 1, 128>}, {pipeline_mode = #tpu.pipeline_mode<synchronous>, transform_indices = @transform_9, window_bounds = array<i64: 128, 128>}, {pipeline_mode = #tpu.pipeline_mode<synchronous>, transform_indices = @transform_10, window_bounds = array<i64: 1, 128>}, {pipeline_mode = #tpu.pipeline_mode<synchronous>, transform_indices = @transform_11, window_bounds = array<i64: 128, 16>}, {pipeline_mode = #tpu.pipeline_mode<synchronous>, transform_indices = @transform_12, window_bounds = array<i64: 1, 16>}, {transform_indices = @transform_13, window_bounds = array<i64: 8, 16>}]} {
    %c0 = arith.constant 0 : index
    %c0_0 = arith.constant 0 : index
    %0 = vector.load %arg1[%c0, %c0_0] : memref<8x16xf32, #tpu.memory_space<vmem>>, vector<8x16xf32>
    %1 = arith.truncf %0 : vector<8x16xf32> to vector<8x16xbf16>
    %c0_1 = arith.constant 0 : index
    %c0_2 = arith.constant 0 : index
    %2 = vector.load %arg2[%c0_1, %c0_2] : memref<16x128xbf16, #tpu.memory_space<vmem>>, vector<16x128xbf16>
    %c0_3 = arith.constant 0 : index
    %c0_4 = arith.constant 0 : index
    %3 = vector.load %arg3[%c0_3, %c0_4] : memref<1x128xf32, #tpu.memory_space<vmem>>, vector<1x128xf32>
    %cst = arith.constant dense<0.000000e+00> : vector<8x128xf32>
    %4 = tpu.matmul %1, %2, %cst {dimension_numbers = #tpu.dot_dimension_numbers<[1], [0], [0], [1], [0, 0, 1, 1], [], []>} : vector<8x16xbf16>, vector<16x128xbf16>, vector<8x128xf32> -> vector<8x128xf32>
    %5 = vector.broadcast %3 : vector<1x128xf32> to vector<8x128xf32>
    %6 = arith.addf %4, %5 : vector<8x128xf32>
    %cst_5 = arith.constant 0.000000e+00 : f32
    %7 = vector.broadcast %cst_5 : f32 to vector<8x128xf32>
    %8 = arith.maximumf %6, %7 : vector<8x128xf32>
    %9 = arith.truncf %8 : vector<8x128xf32> to vector<8x128xbf16>
    %c0_6 = arith.constant 0 : index
    %c0_7 = arith.constant 0 : index
    %10 = vector.load %arg4[%c0_6, %c0_7] : memref<128x128xbf16, #tpu.memory_space<vmem>>, vector<128x128xbf16>
    %c0_8 = arith.constant 0 : index
    %c0_9 = arith.constant 0 : index
    %11 = vector.load %arg5[%c0_8, %c0_9] : memref<1x128xf32, #tpu.memory_space<vmem>>, vector<1x128xf32>
    %cst_10 = arith.constant dense<0.000000e+00> : vector<8x128xf32>
    %12 = tpu.matmul %9, %10, %cst_10 {dimension_numbers = #tpu.dot_dimension_numbers<[1], [0], [0], [1], [0, 0, 1, 1], [], []>} : vector<8x128xbf16>, vector<128x128xbf16>, vector<8x128xf32> -> vector<8x128xf32>
    %13 = vector.broadcast %11 : vector<1x128xf32> to vector<8x128xf32>
    %14 = arith.addf %12, %13 : vector<8x128xf32>
    %cst_11 = arith.constant 0.000000e+00 : f32
    %15 = vector.broadcast %cst_11 : f32 to vector<8x128xf32>
    %16 = arith.maximumf %14, %15 : vector<8x128xf32>
    %17 = arith.truncf %16 : vector<8x128xf32> to vector<8x128xbf16>
    %c0_12 = arith.constant 0 : index
    %c0_13 = arith.constant 0 : index
    %18 = vector.load %arg6[%c0_12, %c0_13] : memref<128x128xbf16, #tpu.memory_space<vmem>>, vector<128x128xbf16>
    %c0_14 = arith.constant 0 : index
    %c0_15 = arith.constant 0 : index
    %19 = vector.load %arg7[%c0_14, %c0_15] : memref<1x128xf32, #tpu.memory_space<vmem>>, vector<1x128xf32>
    %cst_16 = arith.constant dense<0.000000e+00> : vector<8x128xf32>
    %20 = tpu.matmul %17, %18, %cst_16 {dimension_numbers = #tpu.dot_dimension_numbers<[1], [0], [0], [1], [0, 0, 1, 1], [], []>} : vector<8x128xbf16>, vector<128x128xbf16>, vector<8x128xf32> -> vector<8x128xf32>
    %21 = vector.broadcast %19 : vector<1x128xf32> to vector<8x128xf32>
    %22 = arith.addf %20, %21 : vector<8x128xf32>
    %23 = arith.truncf %22 : vector<8x128xf32> to vector<8x128xbf16>
    %c0_17 = arith.constant 0 : index
    %c0_18 = arith.constant 0 : index
    %24 = vector.load %arg8[%c0_17, %c0_18] : memref<128x128xbf16, #tpu.memory_space<vmem>>, vector<128x128xbf16>
    %c0_19 = arith.constant 0 : index
    %c0_20 = arith.constant 0 : index
    %25 = vector.load %arg9[%c0_19, %c0_20] : memref<1x128xf32, #tpu.memory_space<vmem>>, vector<1x128xf32>
    %cst_21 = arith.constant dense<0.000000e+00> : vector<8x128xf32>
    %26 = tpu.matmul %23, %24, %cst_21 {dimension_numbers = #tpu.dot_dimension_numbers<[1], [0], [0], [1], [0, 0, 1, 1], [], []>} : vector<8x128xbf16>, vector<128x128xbf16>, vector<8x128xf32> -> vector<8x128xf32>
    %27 = vector.broadcast %25 : vector<1x128xf32> to vector<8x128xf32>
    %28 = arith.addf %26, %27 : vector<8x128xf32>
    %cst_22 = arith.constant 0.000000e+00 : f32
    %29 = vector.broadcast %cst_22 : f32 to vector<8x128xf32>
    %30 = arith.maximumf %28, %29 : vector<8x128xf32>
    %31 = arith.truncf %30 : vector<8x128xf32> to vector<8x128xbf16>
    %c0_23 = arith.constant 0 : index
    %c0_24 = arith.constant 0 : index
    %32 = vector.load %arg10[%c0_23, %c0_24] : memref<128x128xbf16, #tpu.memory_space<vmem>>, vector<128x128xbf16>
    %c0_25 = arith.constant 0 : index
    %c0_26 = arith.constant 0 : index
    %33 = vector.load %arg11[%c0_25, %c0_26] : memref<1x128xf32, #tpu.memory_space<vmem>>, vector<1x128xf32>
    %cst_27 = arith.constant dense<0.000000e+00> : vector<8x128xf32>
    %34 = tpu.matmul %31, %32, %cst_27 {dimension_numbers = #tpu.dot_dimension_numbers<[1], [0], [0], [1], [0, 0, 1, 1], [], []>} : vector<8x128xbf16>, vector<128x128xbf16>, vector<8x128xf32> -> vector<8x128xf32>
    %35 = vector.broadcast %33 : vector<1x128xf32> to vector<8x128xf32>
    %36 = arith.addf %34, %35 : vector<8x128xf32>
    %cst_28 = arith.constant 0.000000e+00 : f32
    %37 = vector.broadcast %cst_28 : f32 to vector<8x128xf32>
    %38 = arith.maximumf %36, %37 : vector<8x128xf32>
    %39 = arith.truncf %38 : vector<8x128xf32> to vector<8x128xbf16>
    %c0_29 = arith.constant 0 : index
    %c0_30 = arith.constant 0 : index
    %40 = vector.load %arg12[%c0_29, %c0_30] : memref<128x16xbf16, #tpu.memory_space<vmem>>, vector<128x16xbf16>
    %c0_31 = arith.constant 0 : index
    %c0_32 = arith.constant 0 : index
    %41 = vector.load %arg13[%c0_31, %c0_32] : memref<1x16xf32, #tpu.memory_space<vmem>>, vector<1x16xf32>
    %cst_33 = arith.constant dense<0.000000e+00> : vector<8x16xf32>
    %42 = tpu.matmul %39, %40, %cst_33 {dimension_numbers = #tpu.dot_dimension_numbers<[1], [0], [0], [1], [0, 0, 1, 1], [], []>} : vector<8x128xbf16>, vector<128x16xbf16>, vector<8x16xf32> -> vector<8x16xf32>
    %43 = vector.broadcast %41 : vector<1x16xf32> to vector<8x16xf32>
    %44 = arith.addf %42, %43 : vector<8x16xf32>
    %45 = arith.negf %44 : vector<8x16xf32>
    %46 = math.exp %45 : vector<8x16xf32>
    %cst_34 = arith.constant 1.000000e+00 : f32
    %47 = vector.broadcast %cst_34 : f32 to vector<8x16xf32>
    %48 = arith.addf %47, %46 : vector<8x16xf32>
    %49 = arith.divf %47, %48 : vector<8x16xf32>
    %c0_35 = arith.constant 0 : index
    %c0_36 = arith.constant 0 : index
    %50 = vector.load %arg14[%c0_35, %c0_36] : memref<8x16xf32, #tpu.memory_space<vmem>>, vector<8x16xf32>
    tpu.vector_store %arg14[%c0_35, %c0_36], %49 {strides = array<i32>} : memref<8x16xf32, #tpu.memory_space<vmem>>, vector<8x16xf32>,
    return
  }
  func.func @transform_0(%arg0: i32) -> (i32, i32) {
    %c0_i32 = arith.constant 0 : i32
    %c0_i32_0 = arith.constant 0 : i32
    return %arg0, %c0_i32 : i32, i32
  }
  func.func @transform_1(%arg0: i32) -> (i32, i32) {
    %c0_i32 = arith.constant 0 : i32
    %c0_i32_0 = arith.constant 0 : i32
    %c0_i32_1 = arith.constant 0 : i32
    return %c0_i32, %c0_i32_0 : i32, i32
  }
  func.func @transform_2(%arg0: i32) -> (i32, i32) {
    %c0_i32 = arith.constant 0 : i32
    %c0_i32_0 = arith.constant 0 : i32
    %c0_i32_1 = arith.constant 0 : i32
    return %c0_i32, %c0_i32_0 : i32, i32
  }
  func.func @transform_3(%arg0: i32) -> (i32, i32) {
    %c0_i32 = arith.constant 0 : i32
    %c0_i32_0 = arith.constant 0 : i32
    %c0_i32_1 = arith.constant 0 : i32
    return %c0_i32, %c0_i32_0 : i32, i32
  }
  func.func @transform_4(%arg0: i32) -> (i32, i32) {
    %c0_i32 = arith.constant 0 : i32
    %c0_i32_0 = arith.constant 0 : i32
    %c0_i32_1 = arith.constant 0 : i32
    return %c0_i32, %c0_i32_0 : i32, i32
  }
  func.func @transform_5(%arg0: i32) -> (i32, i32) {
    %c0_i32 = arith.constant 0 : i32
    %c0_i32_0 = arith.constant 0 : i32
    %c0_i32_1 = arith.constant 0 : i32
    return %c0_i32, %c0_i32_0 : i32, i32
  }
  func.func @transform_6(%arg0: i32) -> (i32, i32) {
    %c0_i32 = arith.constant 0 : i32
    %c0_i32_0 = arith.constant 0 : i32
    %c0_i32_1 = arith.constant 0 : i32
    return %c0_i32, %c0_i32_0 : i32, i32
  }
  func.func @transform_7(%arg0: i32) -> (i32, i32) {
    %c0_i32 = arith.constant 0 : i32
    %c0_i32_0 = arith.constant 0 : i32
    %c0_i32_1 = arith.constant 0 : i32
    return %c0_i32, %c0_i32_0 : i32, i32
  }
  func.func @transform_8(%arg0: i32) -> (i32, i32) {
    %c0_i32 = arith.constant 0 : i32
    %c0_i32_0 = arith.constant 0 : i32
    %c0_i32_1 = arith.constant 0 : i32
    return %c0_i32, %c0_i32_0 : i32, i32
  }
  func.func @transform_9(%arg0: i32) -> (i32, i32) {
    %c0_i32 = arith.constant 0 : i32
    %c0_i32_0 = arith.constant 0 : i32
    %c0_i32_1 = arith.constant 0 : i32
    return %c0_i32, %c0_i32_0 : i32, i32
  }
  func.func @transform_10(%arg0: i32) -> (i32, i32) {
    %c0_i32 = arith.constant 0 : i32
    %c0_i32_0 = arith.constant 0 : i32
    %c0_i32_1 = arith.constant 0 : i32
    return %c0_i32, %c0_i32_0 : i32, i32
  }
  func.func @transform_11(%arg0: i32) -> (i32, i32) {
    %c0_i32 = arith.constant 0 : i32
    %c0_i32_0 = arith.constant 0 : i32
    %c0_i32_1 = arith.constant 0 : i32
    return %c0_i32, %c0_i32_0 : i32, i32
  }
  func.func @transform_12(%arg0: i32) -> (i32, i32) {
    %c0_i32 = arith.constant 0 : i32
    %c0_i32_0 = arith.constant 0 : i32
    %c0_i32_1 = arith.constant 0 : i32
    return %c0_i32, %c0_i32_0 : i32, i32
  }
  func.func @transform_13(%arg0: i32) -> (i32, i32) {
    %c0_i32 = arith.constant 0 : i32
    %c0_i32_0 = arith.constant 0 : i32
    return %arg0, %c0_i32 : i32, i32
  }
}

module attributes {stable_mosaic.version = 11 : i64} {
  func.func @_fused_mlp_kernel(%arg0: i32, %arg1: memref<8x16xf32, #tpu.memory_space<vmem>>, %arg2: memref<16x128xbf16, #tpu.memory_space<vmem>>, %arg3: memref<1x128xf32, #tpu.memory_space<vmem>>, %arg4: memref<128x128xbf16, #tpu.memory_space<vmem>>, %arg5: memref<1x128xf32, #tpu.memory_space<vmem>>, %arg6: memref<128x128xbf16, #tpu.memory_space<vmem>>, %arg7: memref<1x128xf32, #tpu.memory_space<vmem>>, %arg8: memref<128x128xbf16, #tpu.memory_space<vmem>>, %arg9: memref<1x128xf32, #tpu.memory_space<vmem>>, %arg10: memref<128x128xbf16, #tpu.memory_space<vmem>>, %arg11: memref<1x128xf32, #tpu.memory_space<vmem>>, %arg12: memref<128x16xbf16, #tpu.memory_space<vmem>>, %arg13: memref<1x16xf32, #tpu.memory_space<vmem>>, %arg14: memref<8x16xf32, #tpu.memory_space<vmem>>) attributes {dimension_semantics = [#tpu.dimension_semantics<parallel>], iteration_bounds = array<i64: 1>, scalar_prefetch = 0 : i64, scratch_operands = 0 : i64, tpu.core_type = #tpu.core_type<tc>, window_params = [{transform_indices = @transform_0, window_bounds = array<i64: 8, 16>}, {pipeline_mode = #tpu.pipeline_mode<synchronous>, transform_indices = @transform_1, window_bounds = array<i64: 16, 128>}, {pipeline_mode = #tpu.pipeline_mode<synchronous>, transform_indices = @transform_2, window_bounds = array<i64: 1, 128>}, {pipeline_mode = #tpu.pipeline_mode<synchronous>, transform_indices = @transform_3, window_bounds = array<i64: 128, 128>}, {pipeline_mode = #tpu.pipeline_mode<synchronous>, transform_indices = @transform_4, window_bounds = array<i64: 1, 128>}, {pipeline_mode = #tpu.pipeline_mode<synchronous>, transform_indices = @transform_5, window_bounds = array<i64: 128, 128>}, {pipeline_mode = #tpu.pipeline_mode<synchronous>, transform_indices = @transform_6, window_bounds = array<i64: 1, 128>}, {pipeline_mode = #tpu.pipeline_mode<synchronous>, transform_indices = @transform_7, window_bounds = array<i64: 128, 128>}, {pipeline_mode = #tpu.pipeline_mode<synchronous>, transform_indices = @transform_8, window_bounds = array<i64: 1, 128>}, {pipeline_mode = #tpu.pipeline_mode<synchronous>, transform_indices = @transform_9, window_bounds = array<i64: 128, 128>}, {pipeline_mode = #tpu.pipeline_mode<synchronous>, transform_indices = @transform_10, window_bounds = array<i64: 1, 128>}, {pipeline_mode = #tpu.pipeline_mode<synchronous>, transform_indices = @transform_11, window_bounds = array<i64: 128, 16>}, {pipeline_mode = #tpu.pipeline_mode<synchronous>, transform_indices = @transform_12, window_bounds = array<i64: 1, 16>}, {transform_indices = @transform_13, window_bounds = array<i64: 8, 16>}]} {
    %c0 = arith.constant 0 : index
    %c0_0 = arith.constant 0 : index
    %0 = vector.load %arg1[%c0, %c0_0] : memref<8x16xf32, #tpu.memory_space<vmem>>, vector<8x16xf32>
    %1 = arith.truncf %0 : vector<8x16xf32> to vector<8x16xbf16>
    %c0_1 = arith.constant 0 : index
    %c0_2 = arith.constant 0 : index
    %2 = vector.load %arg2[%c0_1, %c0_2] : memref<16x128xbf16, #tpu.memory_space<vmem>>, vector<16x128xbf16>
    %c0_3 = arith.constant 0 : index
    %c0_4 = arith.constant 0 : index
    %3 = vector.load %arg3[%c0_3, %c0_4] : memref<1x128xf32, #tpu.memory_space<vmem>>, vector<1x128xf32>
    %cst = arith.constant dense<0.000000e+00> : vector<8x128xf32>
    %4 = tpu.matmul %1, %2, %cst {dimension_numbers = #tpu.dot_dimension_numbers<[1], [0], [0], [1], [0, 0, 1, 1], [], []>} : vector<8x16xbf16>, vector<16x128xbf16>, vector<8x128xf32> -> vector<8x128xf32>
    %5 = vector.broadcast %3 : vector<1x128xf32> to vector<8x128xf32>
    %6 = arith.addf %4, %5 : vector<8x128xf32>
    %cst_5 = arith.constant 0.000000e+00 : f32
    %7 = vector.broadcast %cst_5 : f32 to vector<8x128xf32>
    %8 = arith.maximumf %6, %7 : vector<8x128xf32>
    %9 = arith.truncf %8 : vector<8x128xf32> to vector<8x128xbf16>
    %c0_6 = arith.constant 0 : index
    %c0_7 = arith.constant 0 : index
    %10 = vector.load %arg4[%c0_6, %c0_7] : memref<128x128xbf16, #tpu.memory_space<vmem>>, vector<128x128xbf16>
    %c0_8 = arith.constant 0 : index
    %c0_9 = arith.constant 0 : index
    %11 = vector.load %arg5[%c0_8, %c0_9] : memref<1x128xf32, #tpu.memory_space<vmem>>, vector<1x128xf32>
    %cst_10 = arith.constant dense<0.000000e+00> : vector<8x128xf32>
    %12 = tpu.matmul %9, %10, %cst_10 {dimension_numbers = #tpu.dot_dimension_numbers<[1], [0], [0], [1], [0, 0, 1, 1], [], []>} : vector<8x128xbf16>, vector<128x128xbf16>, vector<8x128xf32> -> vector<8x128xf32>
    %13 = vector.broadcast %11 : vector<1x128xf32> to vector<8x128xf32>
    %14 = arith.addf %12, %13 : vector<8x128xf32>
    %cst_11 = arith.constant 0.000000e+00 : f32
    %15 = vector.broadcast %cst_11 : f32 to vector<8x128xf32>
    %16 = arith.maximumf %14, %15 : vector<8x128xf32>
    %17 = arith.truncf %16 : vector<8x128xf32> to vector<8x128xbf16>
    %c0_12 = arith.constant 0 : index
    %c0_13 = arith.constant 0 : index
    %18 = vector.load %arg6[%c0_12, %c0_13] : memref<128x128xbf16, #tpu.memory_space<vmem>>, vector<128x128xbf16>
    %c0_14 = arith.constant 0 : index
    %c0_15 = arith.constant 0 : index
    %19 = vector.load %arg7[%c0_14, %c0_15] : memref<1x128xf32, #tpu.memory_space<vmem>>, vector<1x128xf32>
    %cst_16 = arith.constant dense<0.000000e+00> : vector<8x128xf32>
    %20 = tpu.matmul %17, %18, %cst_16 {dimension_numbers = #tpu.dot_dimension_numbers<[1], [0], [0], [1], [0, 0, 1, 1], [], []>} : vector<8x128xbf16>, vector<128x128xbf16>, vector<8x128xf32> -> vector<8x128xf32>
    %21 = vector.broadcast %19 : vector<1x128xf32> to vector<8x128xf32>
    %22 = arith.addf %20, %21 : vector<8x128xf32>
    %23 = arith.truncf %22 : vector<8x128xf32> to vector<8x128xbf16>
    %c0_17 = arith.constant 0 : index
    %c0_18 = arith.constant 0 : index
    %24 = vector.load %arg8[%c0_17, %c0_18] : memref<128x128xbf16, #tpu.memory_space<vmem>>, vector<128x128xbf16>
    %c0_19 = arith.constant 0 : index
    %c0_20 = arith.constant 0 : index
    %25 = vector.load %arg9[%c0_19, %c0_20] : memref<1x128xf32, #tpu.memory_space<vmem>>, vector<1x128xf32>
    %cst_21 = arith.constant dense<0.000000e+00> : vector<8x128xf32>
    %26 = tpu.matmul %23, %24, %cst_21 {dimension_numbers = #tpu.dot_dimension_numbers<[1], [0], [0], [1], [0, 0, 1, 1], [], []>} : vector<8x128xbf16>, vector<128x128xbf16>, vector<8x128xf32> -> vector<8x128xf32>
    %27 = vector.broadcast %25 : vector<1x128xf32> to vector<8x128xf32>
    %28 = arith.addf %26, %27 : vector<8x128xf32>
    %cst_22 = arith.constant 0.000000e+00 : f32
    %29 = vector.broadcast %cst_22 : f32 to vector<8x128xf32>
    %30 = arith.maximumf %28, %29 : vector<8x128xf32>
    %31 = arith.truncf %30 : vector<8x128xf32> to vector<8x128xbf16>
    %c0_23 = arith.constant 0 : index
    %c0_24 = arith.constant 0 : index
    %32 = vector.load %arg10[%c0_23, %c0_24] : memref<128x128xbf16, #tpu.memory_space<vmem>>, vector<128x128xbf16>
    %c0_25 = arith.constant 0 : index
    %c0_26 = arith.constant 0 : index
    %33 = vector.load %arg11[%c0_25, %c0_26] : memref<1x128xf32, #tpu.memory_space<vmem>>, vector<1x128xf32>
    %cst_27 = arith.constant dense<0.000000e+00> : vector<8x128xf32>
    %34 = tpu.matmul %31, %32, %cst_27 {dimension_numbers = #tpu.dot_dimension_numbers<[1], [0], [0], [1], [0, 0, 1, 1], [], []>} : vector<8x128xbf16>, vector<128x128xbf16>, vector<8x128xf32> -> vector<8x128xf32>
    %35 = vector.broadcast %33 : vector<1x128xf32> to vector<8x128xf32>
    %36 = arith.addf %34, %35 : vector<8x128xf32>
    %cst_28 = arith.constant 0.000000e+00 : f32
    %37 = vector.broadcast %cst_28 : f32 to vector<8x128xf32>
    %38 = arith.maximumf %36, %37 : vector<8x128xf32>
    %39 = arith.truncf %38 : vector<8x128xf32> to vector<8x128xbf16>
    %c0_29 = arith.constant 0 : index
    %c0_30 = arith.constant 0 : index
    %40 = vector.load %arg12[%c0_29, %c0_30] : memref<128x16xbf16, #tpu.memory_space<vmem>>, vector<128x16xbf16>
    %c0_31 = arith.constant 0 : index
    %c0_32 = arith.constant 0 : index
    %41 = vector.load %arg13[%c0_31, %c0_32] : memref<1x16xf32, #tpu.memory_space<vmem>>, vector<1x16xf32>
    %cst_33 = arith.constant dense<0.000000e+00> : vector<8x16xf32>
    %42 = tpu.matmul %39, %40, %cst_33 {dimension_numbers = #tpu.dot_dimension_numbers<[1], [0], [0], [1], [0, 0, 1, 1], [], []>} : vector<8x128xbf16>, vector<128x16xbf16>, vector<8x16xf32> -> vector<8x16xf32>
    %43 = vector.broadcast %41 : vector<1x16xf32> to vector<8x16xf32>
    %44 = arith.addf %42, %43 : vector<8x16xf32>
    %45 = arith.negf %44 : vector<8x16xf32>
    %46 = math.exp %45 : vector<8x16xf32>
    %cst_34 = arith.constant 1.000000e+00 : f32
    %47 = vector.broadcast %cst_34 : f32 to vector<8x16xf32>
    %48 = arith.addf %47, %46 : vector<8x16xf32>
    %49 = arith.divf %47, %48 : vector<8x16xf32>
    %c0_35 = arith.constant 0 : index
    %c0_36 = arith.constant 0 : index
    %50 = vector.load %arg14[%c0_35, %c0_36] : memref<8x16xf32, #tpu.memory_space<vmem>>, vector<8x16xf32>
    tpu.vector_store %arg14[%c0_35, %c0_36], %49 {strides = array<i32>} : memref<8x16xf32, #tpu.memory_space<vmem>>, vector<8x16xf32>,
    return
  }
  func.func @transform_0(%arg0: i32) -> (i32, i32) {
    %c0_i32 = arith.constant 0 : i32
    %c0_i32_0 = arith.constant 0 : i32
    return %arg0, %c0_i32 : i32, i32
  }
  func.func @transform_1(%arg0: i32) -> (i32, i32) {
    %c0_i32 = arith.constant 0 : i32
    %c0_i32_0 = arith.constant 0 : i32
    %c0_i32_1 = arith.constant 0 : i32
    return %c0_i32, %c0_i32_0 : i32, i32
  }
  func.func @transform_2(%arg0: i32) -> (i32, i32) {
    %c0_i32 = arith.constant 0 : i32
    %c0_i32_0 = arith.constant 0 : i32
    %c0_i32_1 = arith.constant 0 : i32
    return %c0_i32, %c0_i32_0 : i32, i32
  }
  func.func @transform_3(%arg0: i32) -> (i32, i32) {
    %c0_i32 = arith.constant 0 : i32
    %c0_i32_0 = arith.constant 0 : i32
    %c0_i32_1 = arith.constant 0 : i32
    return %c0_i32, %c0_i32_0 : i32, i32
  }
  func.func @transform_4(%arg0: i32) -> (i32, i32) {
    %c0_i32 = arith.constant 0 : i32
    %c0_i32_0 = arith.constant 0 : i32
    %c0_i32_1 = arith.constant 0 : i32
    return %c0_i32, %c0_i32_0 : i32, i32
  }
  func.func @transform_5(%arg0: i32) -> (i32, i32) {
    %c0_i32 = arith.constant 0 : i32
    %c0_i32_0 = arith.constant 0 : i32
    %c0_i32_1 = arith.constant 0 : i32
    return %c0_i32, %c0_i32_0 : i32, i32
  }
  func.func @transform_6(%arg0: i32) -> (i32, i32) {
    %c0_i32 = arith.constant 0 : i32
    %c0_i32_0 = arith.constant 0 : i32
    %c0_i32_1 = arith.constant 0 : i32
    return %c0_i32, %c0_i32_0 : i32, i32
  }
  func.func @transform_7(%arg0: i32) -> (i32, i32) {
    %c0_i32 = arith.constant 0 : i32
    %c0_i32_0 = arith.constant 0 : i32
    %c0_i32_1 = arith.constant 0 : i32
    return %c0_i32, %c0_i32_0 : i32, i32
  }
  func.func @transform_8(%arg0: i32) -> (i32, i32) {
    %c0_i32 = arith.constant 0 : i32
    %c0_i32_0 = arith.constant 0 : i32
    %c0_i32_1 = arith.constant 0 : i32
    return %c0_i32, %c0_i32_0 : i32, i32
  }
  func.func @transform_9(%arg0: i32) -> (i32, i32) {
    %c0_i32 = arith.constant 0 : i32
    %c0_i32_0 = arith.constant 0 : i32
    %c0_i32_1 = arith.constant 0 : i32
    return %c0_i32, %c0_i32_0 : i32, i32
  }
  func.func @transform_10(%arg0: i32) -> (i32, i32) {
    %c0_i32 = arith.constant 0 : i32
    %c0_i32_0 = arith.constant 0 : i32
    %c0_i32_1 = arith.constant 0 : i32
    return %c0_i32, %c0_i32_0 : i32, i32
  }
  func.func @transform_11(%arg0: i32) -> (i32, i32) {
    %c0_i32 = arith.constant 0 : i32
    %c0_i32_0 = arith.constant 0 : i32
    %c0_i32_1 = arith.constant 0 : i32
    return %c0_i32, %c0_i32_0 : i32, i32
  }
  func.func @transform_12(%arg0: i32) -> (i32, i32) {
    %c0_i32 = arith.constant 0 : i32
    %c0_i32_0 = arith.constant 0 : i32
    %c0_i32_1 = arith.constant 0 : i32
    return %c0_i32, %c0_i32_0 : i32, i32
  }
  func.func @transform_13(%arg0: i32) -> (i32, i32) {
    %c0_i32 = arith.constant 0 : i32
    %c0_i32_0 = arith.constant 0 : i32
    return %arg0, %c0_i32 : i32, i32
  }
}

</mosaic_0001>

<bundles_post_ra>
// kernel: tpu_custom_call.1
= control target key start
LH: loop header
LB: loop body
LE: loop exit
PB: predicated region body
PF: predicated region fallthrough
CT: control target
= control target key end

     0   :  { %18 = vsyncpa [#allocation3], 0  ;;  %s1344_s0 = inlined_call_operand.vmem [shape: f32[8,16], index: 0, kind: input, shape index: {}]   ;;  %s1345_s1 = inlined_call_operand.hbm [shape: bf16[16,128], index: 1, kind: input, shape index: {}]   ;;  %s1346_s2 = inlined_call_operand.vmem [shape: f32[1,128], index: 2, kind: input, shape index: {}]   ;;  %s1347_s3 = inlined_call_operand.vmem [shape: bf16[128,128], index: 3, kind: input, shape index: {}]   ;;  %s1348_s4 = inlined_call_operand.vmem [shape: f32[1,128], index: 4, kind: input, shape index: {}]   ;;  %s1349_s5 = inlined_call_operand.hbm [shape: bf16[128,128], index: 5, kind: input, shape index: {}]   ;;  %s1350_s6 = inlined_call_operand.vmem [shape: f32[1,128], index: 6, kind: input, shape index: {}]   ;;  %s1351_s7 = inlined_call_operand.hbm [shape: bf16[128,128], index: 7, kind: input, shape index: {}]   ;;  %s1352_s8 = inlined_call_operand.vmem [shape: f32[1,128], index: 8, kind: input, shape index: {}]   ;;  %s1353_s9 = inlined_call_operand.hbm [shape: bf16[128,128], index: 9, kind: input, shape index: {}]   ;;  %s1354_s10 = inlined_call_operand.vmem [shape: f32[1,128], index: 10, kind: input, shape index: {}]   ;;  %s1355_s11 = inlined_call_operand.vmem [shape: bf16[128,16], index: 11, kind: input, shape index: {}]   ;;  %s1356_s12 = inlined_call_operand.vmem [shape: f32[1,16], index: 12, kind: input, shape index: {}]   ;;  %s1357_s13 = inlined_call_operand.hbm [shape: f32[8,16], index: 13, kind: output, shape index: {}]  }
   0x1   :  { %19 = vsyncpa [#allocation6], 0 }
   0x2   :  { %20 = vsyncpa [#allocation9], 0 }
   0x3   :  { %21 = vsyncpa [#allocation4], 0  ;;  %s1114_s25 = smov [#allocation5]   ;;  %s1115_s27 = smov [#allocation2]  }
   0x4   :  { %s47_s26 = sshll.u32 %s1114_s25, 4  ;;  %s29_s28 = sshll.u32 %s1115_s27, 4  ;;  %s48_s26 = int_to_ptr.vmem [resolvable:$true] %s47_s26  ;;  %s30_s28 = int_to_ptr.vmem [resolvable:$true] %s29_s28 }
   0x5   :  { %s1014_s29 = scalar_lea.vmem %s48_s26, 1024  ;;  %p1019_p1 = scmp.lt.s32.totalorder %s48_s26, %s48_s26 }
   0x6   :  { %p1015_p0 = scmp.ne.s32.totalorder %s48_s26, %s1014_s29  ;;  %p1020_p2 = scmp.lt.s32.totalorder %s1014_s29, %s1014_s29 }
   0x8   :  { %p1021_p3 = por %p1020_p2, %p1019_p1 }
   0xa   :  { %p1022_p4 = pnand %p1021_p3, %p1015_p0 }
   0xc   :  { %1025 = shalt.err (!%p1022_p4)
}
   0xd   :  { %s1116_s30 = smov 64   ;;  %s1117_s14 = smov 4  }
   0xe   :  { %53 = dma.hbm_to_vmem [thread:$0]  %s1349_s5, 1024, %s48_s26, [#allocation6], %s1116_s30, %s1116_s30, %s1117_s14  }
   0xf   :  { %s1034_s17 = scalar_lea.vmem %s30_s28, 128  ;;  %p1039_p6 = scmp.lt.s32.totalorder %s30_s28, %s30_s28 }
  0x10   :  { %p1035_p5 = scmp.ne.s32.totalorder %s30_s28, %s1034_s17  ;;  %p1040_p7 = scmp.lt.s32.totalorder %s1034_s17, %s1034_s17 }
  0x12   :  { %p1041_p8 = por %p1040_p7, %p1039_p6 }
  0x14   :  { %p1042_p9 = pnand %p1041_p8, %p1035_p5 }
  0x16   :  { %1045 = shalt.err (!%p1042_p9)
}
  0x17   :  { %35 = dma.hbm_to_vmem [thread:$0]  %s1345_s1, 128, %s30_s28, [#allocation3], %s1116_s30, %s1116_s30, %s1117_s14  }
  0x18   :  { %s1118_s20 = smov [#allocation7]   ;;  %s1119_s22 = smov [#allocation8]  }
  0x19   :  { %s61_s21 = sshll.u32 %s1118_s20, 4  ;;  %s75_s23 = sshll.u32 %s1119_s22, 4  ;;  %s62_s21 = int_to_ptr.vmem [resolvable:$true] %s61_s21  ;;  %s76_s23 = int_to_ptr.vmem [resolvable:$true] %s75_s23 }
  0x1a   :  { %s1054_s5 = scalar_lea.vmem %s62_s21, 1024  ;;  %p1059_p11 = scmp.lt.s32.totalorder %s62_s21, %s62_s21 }
  0x1b   :  { %p1055_p10 = scmp.ne.s32.totalorder %s62_s21, %s1054_s5  ;;  %p1060_p12 = scmp.lt.s32.totalorder %s1054_s5, %s1054_s5 }
  0x1d   :  { %p1061_p13 = por %p1060_p12, %p1059_p11 }
  0x1f   :  { %p1062_p0 = pnand %p1061_p13, %p1055_p10 }
  0x21   :  { %1065 = shalt.err (!%p1062_p0)
}
  0x22   :  { %67 = dma.hbm_to_vmem [thread:$0]  %s1351_s7, 1024, %s62_s21, [#allocation6], %s1116_s30, %s1116_s30, %s1117_s14  }
  0x23   :  { %s1074_s1 = scalar_lea.vmem %s76_s23, 1024  ;;  %p1079_p2 = scmp.lt.s32.totalorder %s76_s23, %s76_s23 }
  0x24   :  { %p1075_p1 = scmp.ne.s32.totalorder %s76_s23, %s1074_s1  ;;  %p1080_p3 = scmp.lt.s32.totalorder %s1074_s1, %s1074_s1 }
  0x26   :  { %p1081_p4 = por %p1080_p3, %p1079_p2 }
  0x28   :  { %p1082_p5 = pnand %p1081_p4, %p1075_p1 }
  0x2a   :  { %1085 = shalt.err (!%p1082_p5)
}
  0x2b   :  { %81 = dma.hbm_to_vmem [thread:$0]  %s1353_s9, 1024, %s76_s23, [#allocation9], %s1116_s30, %s1116_s30, %s1117_s14  }
  0x2c   :  { %1106 = dma.done.wait [#allocation3], 128  }
  0x2d   :  { %1107 = vsyncadd [#allocation3], 4294967168 }
  0x2e   :  { %1108 = dma.done.wait [#allocation6], 2048  }
  0x2f   :  { %1109 = vsyncadd [#allocation6], 4294965248 }
  0x30   :  { %1110 = dma.done.wait [#allocation9], 1024  }
  0x31   :  { %1111 = vsyncadd [#allocation9], 4294966272  ;;  %v1120_v0 = vmov 0.0   ;;  %vm1121_vm0 = vmmov 0   ;;  %v961_v1 = vld [vmem:[#allocation2] sm:$0xff]   ;;  %vm118_vm1 = vcmask 130048  }
  0x32   :  { %846 = vmatprep.subr.bf16.mxu0 %v1120_v0  ;;  %848 = vmatprep.mubr.msk.bf16.mxu0 %vm1121_vm0, %v1120_v0  ;;  %v101_v2 = vld [vmem:[%s1344_s0] sm:$0xff]  ;;  %v962_v4 = vld [vmem:[%s1347_s3 + $0x38] sm:$0xff]   ;;  %v963_v5 = vld [vmem:[%s1347_s3 + $0x30] sm:$0xff]  }
  0x33   :  { %852 = vmatprep.subr.bf16.mxu1 %v1120_v0  ;;  %868 = vmatprep.mubr.msk.bf16.mxu1 %vm1121_vm0, %v1120_v0  ;;  %v102_v3 = vpack.c.bf16 %v101_v2, %v101_v2  ;;  %v964_v6 = vld [vmem:[%s1347_s3 + $0x28] sm:$0xff]   ;;  %v965_v7 = vld [vmem:[%s1347_s3 + $0x20] sm:$0xff]   ;;  %v966_v8 = vld [vmem:[%s1347_s3 + $0x18] sm:$0xff]  }
  0x34   :  { %847 = vmatpush3.bf16.msra.mxu0 %v961_v1  ;;  %853 = vmatpush3.bf16.msra.mxu1 %v962_v4  ;;  %v967_v9 = vld [vmem:[%s1347_s3 + $0x10] sm:$0xff]   ;;  %v968_v10 = vld [vmem:[%s1347_s3 + $0x8] sm:$0xff]   ;;  %v969_v11 = vld [vmem:[%s1347_s3] sm:$0xff]  }
  0x35   :  { %872 = vmatprep.subr.bf16.mxu0 %v1120_v0  ;;  %854 = vmatprep.subr.bf16.mxu1 %v1120_v0  ;;  %v970_v12 = vld [vmem:[#allocation5 + $0x38] sm:$0xff]   ;;  %v971_v13 = vld [vmem:[#allocation5 + $0x30] sm:$0xff]   ;;  %v972_v14 = vld [vmem:[#allocation5 + $0x28] sm:$0xff]  }
  0x36   :  { %v973_v15 = vld [vmem:[#allocation5 + $0x20] sm:$0xff]   ;;  %v974_v16 = vld [vmem:[#allocation5 + $0x18] sm:$0xff]   ;;  %v975_v17 = vld [vmem:[#allocation5 + $0x10] sm:$0xff]  }
  0x37   :  { %849 = vmatmul.mubr.msk.bf16.vlgmr.msra.gmra.mxu0 %vm118_vm1, %v102_v3  ;;  %v750_v18 = vld [vmem:[%s1346_s2] ss:$0 sm:$0xff]  ;;  %v976_v26 = vld [vmem:[#allocation5 + $0x8] sm:$0xff]   ;;  %v977_v27 = vld [vmem:[#allocation5] sm:$0xff]  }
  0x38   :  { %888 = vmatprep.mubr.msk.bf16.mxu0 %vm1121_vm0, %v1120_v0  ;;  %855 = vmatpush3.bf16.msra.mxu1 %v963_v5  ;;  %v978_v28 = vld [vmem:[#allocation7 + $0x38] sm:$0xff]   ;;  %v979_v29 = vld [vmem:[#allocation7 + $0x30] sm:$0xff]   ;;  %v980_v30 = vld [vmem:[#allocation7 + $0x28] sm:$0xff]  }
  0x39   :  { %856 = vmatprep.subr.bf16.mxu1 %v1120_v0  ;;  %873 = vmatpush3.bf16.msra.mxu0 %v970_v12  ;;  %v981_v31 = vld [vmem:[#allocation7 + $0x20] sm:$0xff]   ;;  %v982_v32 = vld [vmem:[#allocation7 + $0x18] sm:$0xff]   ;;  %v983_v33 = vld [vmem:[#allocation7 + $0x10] sm:$0xff]  }
  0x3a   :  { %874 = vmatprep.subr.bf16.mxu0 %v1120_v0  ;;  %v984_v34 = vld [vmem:[#allocation7 + $0x8] sm:$0xff]   ;;  %v753_v35 = vld [vmem:[%s1348_s4] ss:$0 sm:$0xff]  ;;  %v985_v43 = vld [vmem:[#allocation7] sm:$0xff]  }
  0x3b   :  { %v986_v44 = vld [vmem:[#allocation8 + $0x38] sm:$0xff]   ;;  %v987_v45 = vld [vmem:[#allocation8 + $0x30] sm:$0xff]   ;;  %v988_v46 = vld [vmem:[#allocation8 + $0x28] sm:$0xff]  }
  0x3c   :  { %857 = vmatpush3.bf16.msra.mxu1 %v964_v6  ;;  %v989_v47 = vld [vmem:[#allocation8 + $0x20] sm:$0xff]   ;;  %v990_v48 = vld [vmem:[#allocation8 + $0x18] sm:$0xff]   ;;  %v991_v49 = vld [vmem:[#allocation8 + $0x10] sm:$0xff]  }
  0x3d   :  { %858 = vmatprep.subr.bf16.mxu1 %v1120_v0  ;;  %875 = vmatpush3.bf16.msra.mxu0 %v971_v13  ;;  %v762_v50 = vld [vmem:[%s1350_s6] ss:$0 sm:$0xff]  ;;  %v992_v57 = vld [vmem:[#allocation8 + $0x8] sm:$0xff]   ;;  %v993_v58 = vld [vmem:[#allocation8] sm:$0xff]  }
  0x3e   :  { %876 = vmatprep.subr.bf16.mxu0 %v1120_v0  ;;  %v994_v59 = vld [vmem:[%s1355_s11 + $0x38] sm:$0xff]   ;;  %v995_v60 = vld [vmem:[%s1355_s11 + $0x30] sm:$0xff]   ;;  %v996_v61 = vld [vmem:[%s1355_s11 + $0x28] sm:$0xff]  }
  0x3f   :  { %v997_v62 = vld [vmem:[%s1355_s11 + $0x20] sm:$0xff]   ;;  %v998_v63 = vld [vmem:[%s1355_s11 + $0x18] sm:$0xff]   ;;  %v999_v1 = vld [vmem:[%s1355_s11 + $0x10] sm:$0xff]  }
  0x40   :  { %859 = vmatpush3.bf16.msra.mxu1 %v965_v7  ;;  %v771_v2 = vld [vmem:[%s1352_s8] ss:$0 sm:$0xff] }
  0x41   :  { %860 = vmatprep.subr.bf16.mxu1 %v1120_v0  ;;  %877 = vmatpush3.bf16.msra.mxu0 %v972_v14  ;;  %v780_v12 = vld [vmem:[%s1354_s10] ss:$0 sm:$0xff]  ;;  %s1122_s10 = smov [#allocation10]  }
  0x42   :  { %878 = vmatprep.subr.bf16.mxu0 %v1120_v0 }
  0x44   :  { %861 = vmatpush3.bf16.msra.mxu1 %v966_v8 }
  0x45   :  { %862 = vmatprep.subr.bf16.mxu1 %v1120_v0  ;;  %879 = vmatpush3.bf16.msra.mxu0 %v973_v15 }
  0x46   :  { %880 = vmatprep.subr.bf16.mxu0 %v1120_v0 }
  0x48   :  { %863 = vmatpush3.bf16.msra.mxu1 %v967_v9 }
  0x49   :  { %864 = vmatprep.subr.bf16.mxu1 %v1120_v0  ;;  %881 = vmatpush3.bf16.msra.mxu0 %v974_v16 }
  0x4a   :  { %882 = vmatprep.subr.bf16.mxu0 %v1120_v0 }
  0x4c   :  { %865 = vmatpush3.bf16.msra.mxu1 %v968_v10  ;;  %v1000_v10 = vld [vmem:[%s1355_s11 + $0x8] sm:$0xff]  }
  0x4d   :  { %866 = vmatprep.subr.bf16.mxu1 %v1120_v0  ;;  %883 = vmatpush3.bf16.msra.mxu0 %v975_v17 }
  0x4e   :  { %884 = vmatprep.subr.bf16.mxu0 %v1120_v0 }
  0x50   :  { %867 = vmatpush3.bf16.msra.mxu1 %v969_v11  ;;  %v1001_v11 = vld [vmem:[%s1355_s11] sm:$0xff]   ;;  %s739_s11 = sshll.u32 %s1122_s10, 4  ;;  %s740_s11 = int_to_ptr.vmem [resolvable:$true] %s739_s11 }
  0x51   :  { %892 = vmatprep.subr.bf16.mxu1 %v1120_v0  ;;  %885 = vmatpush3.bf16.msra.mxu0 %v976_v26  ;;  %s1086_s25 = scalar_lea.vmem %s740_s11, 128  ;;  %p1091_p7 = scmp.lt.s32.totalorder %s740_s11, %s740_s11 }
  0x52   :  { %886 = vmatprep.subr.bf16.mxu0 %v1120_v0  ;;  %p1087_p6 = scmp.ne.s32.totalorder %s740_s11, %s1086_s25  ;;  %p1092_p8 = scmp.lt.s32.totalorder %s1086_s25, %s1086_s25 }
  0x54   :  { %p1093_p9 = por %p1092_p8, %p1091_p7 }
  0x55   :  { %887 = vmatpush3.bf16.msra.mxu0 %v977_v27 }
  0x56   :  { %912 = vmatprep.subr.bf16.mxu0 %v1120_v0  ;;  %p1094_p10 = pnand %p1093_p9, %p1087_p6 }
  0xf7   :  { %v156_v19 = vpop.f32.mrf.mxu0 }
  0xf8   :  { %v157_v20 = vadd.f32 %v750_v18, %v156_v19 }
  0xf9   :  { %v850_v21 = vpop.f32.mrf.mxu0 }
  0xfa   :  { %v162_v22 = vmax.f32 %v157_v20, 0.0 }
  0xfb   :  { %v159_v23 = vpop.f32.mrf.mxu0 }
  0xfc   :  { %v163_v24 = vpack.c.bf16 %v162_v22, %v162_v22 }
  0xfd   :  { %v851_v25 = vpop.f32.mrf.mxu0 }
  0xfe   :  { %869 = vmatmul.mubr.bf16.vlgmr.msra.gmra.mxu1 %v163_v24 }
  0xff   :  { %908 = vmatprep.mubr.msk.bf16.mxu1 %vm1121_vm0, %v1120_v0  ;;  %893 = vmatpush3.bf16.msra.mxu1 %v978_v28 }
 0x100   :  { %894 = vmatprep.subr.bf16.mxu1 %v1120_v0 }
 0x103   :  { %895 = vmatpush3.bf16.msra.mxu1 %v979_v29 }
 0x104   :  { %896 = vmatprep.subr.bf16.mxu1 %v1120_v0 }
 0x107   :  { %897 = vmatpush3.bf16.msra.mxu1 %v980_v30 }
 0x108   :  { %898 = vmatprep.subr.bf16.mxu1 %v1120_v0 }
 0x10b   :  { %899 = vmatpush3.bf16.msra.mxu1 %v981_v31 }
 0x10c   :  { %900 = vmatprep.subr.bf16.mxu1 %v1120_v0 }
 0x10f   :  { %901 = vmatpush3.bf16.msra.mxu1 %v982_v32 }
 0x110   :  { %902 = vmatprep.subr.bf16.mxu1 %v1120_v0 }
 0x113   :  { %903 = vmatpush3.bf16.msra.mxu1 %v983_v33 }
 0x114   :  { %904 = vmatprep.subr.bf16.mxu1 %v1120_v0 }
 0x117   :  { %905 = vmatpush3.bf16.msra.mxu1 %v984_v34 }
 0x118   :  { %906 = vmatprep.subr.bf16.mxu1 %v1120_v0 }
 0x11b   :  { %907 = vmatpush3.bf16.msra.mxu1 %v985_v43 }
 0x11c   :  { %932 = vmatprep.subr.bf16.mxu1 %v1120_v0 }
 0x1be   :  { %v269_v36 = vpop.f32.mrf.mxu1 }
 0x1bf   :  { %v270_v37 = vadd.f32 %v753_v35, %v269_v36 }
 0x1c0   :  { %v870_v38 = vpop.f32.mrf.mxu1 }
 0x1c1   :  { %v275_v39 = vmax.f32 %v270_v37, 0.0 }
 0x1c2   :  { %v272_v40 = vpop.f32.mrf.mxu1 }
 0x1c3   :  { %v276_v41 = vpack.c.bf16 %v275_v39, %v275_v39 }
 0x1c4   :  { %v871_v42 = vpop.f32.mrf.mxu1 }
 0x1c5   :  { %889 = vmatmul.mubr.bf16.vlgmr.msra.gmra.mxu0 %v276_v41 }
 0x1c6   :  { %928 = vmatprep.mubr.msk.bf16.mxu0 %vm1121_vm0, %v1120_v0  ;;  %913 = vmatpush3.bf16.msra.mxu0 %v986_v44 }
 0x1c7   :  { %914 = vmatprep.subr.bf16.mxu0 %v1120_v0 }
 0x1ca   :  { %915 = vmatpush3.bf16.msra.mxu0 %v987_v45 }
 0x1cb   :  { %916 = vmatprep.subr.bf16.mxu0 %v1120_v0 }
 0x1ce   :  { %917 = vmatpush3.bf16.msra.mxu0 %v988_v46 }
 0x1cf   :  { %918 = vmatprep.subr.bf16.mxu0 %v1120_v0 }
 0x1d2   :  { %919 = vmatpush3.bf16.msra.mxu0 %v989_v47 }
 0x1d3   :  { %920 = vmatprep.subr.bf16.mxu0 %v1120_v0 }
 0x1d6   :  { %921 = vmatpush3.bf16.msra.mxu0 %v990_v48 }
 0x1d7   :  { %922 = vmatprep.subr.bf16.mxu0 %v1120_v0 }
 0x1da   :  { %923 = vmatpush3.bf16.msra.mxu0 %v991_v49 }
 0x1db   :  { %924 = vmatprep.subr.bf16.mxu0 %v1120_v0 }
 0x1de   :  { %925 = vmatpush3.bf16.msra.mxu0 %v992_v57 }
 0x1df   :  { %926 = vmatprep.subr.bf16.mxu0 %v1120_v0 }
 0x1e2   :  { %927 = vmatpush3.bf16.msra.mxu0 %v993_v58 }
 0x285   :  { %v382_v51 = vpop.f32.mrf.mxu0 }
 0x286   :  { %v383_v52 = vadd.f32 %v762_v50, %v382_v51 }
 0x287   :  { %v890_v53 = vpop.f32.mrf.mxu0 }
 0x288   :  { %v388_v54 = vpack.c.bf16 %v383_v52, %v383_v52 }
 0x289   :  { %v385_v55 = vpop.f32.mrf.mxu0 }
 0x28a   :  { %909 = vmatmul.mubr.bf16.vlgmr.msra.gmra.mxu1 %v388_v54 }
 0x28b   :  { %v891_v56 = vpop.f32.mrf.mxu0  ;;  %948 = vmatprep.mubr.msk.bf16.mxu1 %vm1121_vm0, %v1120_v0  ;;  %933 = vmatpush3.bf16.msra.mxu1 %v994_v59 }
 0x28c   :  { %934 = vmatprep.subr.bf16.mxu1 %v1120_v0 }
 0x28f   :  { %935 = vmatpush3.bf16.msra.mxu1 %v995_v60 }
 0x290   :  { %936 = vmatprep.subr.bf16.mxu1 %v1120_v0 }
 0x293   :  { %937 = vmatpush3.bf16.msra.mxu1 %v996_v61 }
 0x294   :  { %938 = vmatprep.subr.bf16.mxu1 %v1120_v0 }
 0x297   :  { %939 = vmatpush3.bf16.msra.mxu1 %v997_v62 }
 0x298   :  { %940 = vmatprep.subr.bf16.mxu1 %v1120_v0 }
 0x29b   :  { %941 = vmatpush3.bf16.msra.mxu1 %v998_v63 }
 0x29c   :  { %942 = vmatprep.subr.bf16.mxu1 %v1120_v0 }
 0x29f   :  { %943 = vmatpush3.bf16.msra.mxu1 %v999_v1 }
 0x2a0   :  { %944 = vmatprep.subr.bf16.mxu1 %v1120_v0 }
 0x2a3   :  { %945 = vmatpush3.bf16.msra.mxu1 %v1000_v10 }
 0x2a4   :  { %946 = vmatprep.subr.bf16.mxu1 %v1120_v0  ;;  %v789_v0 = vld [vmem:[%s1356_s12] ss:$0 sm:$0xff] }
 0x2a7   :  { %947 = vmatpush3.bf16.msra.mxu1 %v1001_v11 }
 0x34a   :  { %v494_v3 = vpop.f32.mrf.mxu1 }
 0x34b   :  { %v495_v4 = vadd.f32 %v771_v2, %v494_v3 }
 0x34c   :  { %v910_v5 = vpop.f32.mrf.mxu1 }
 0x34d   :  { %v500_v6 = vmax.f32 %v495_v4, 0.0 }
 0x34e   :  { %v497_v7 = vpop.f32.mrf.mxu1 }
 0x34f   :  { %v501_v8 = vpack.c.bf16 %v500_v6, %v500_v6 }
 0x350   :  { %v911_v9 = vpop.f32.mrf.mxu1 }
 0x351   :  { %929 = vmatmul.mubr.bf16.vlgmr.msra.gmra.mxu0 %v501_v8 }
 0x411   :  { %v607_v13 = vpop.f32.mrf.mxu0 }
 0x412   :  { %v608_v14 = vadd.f32 %v780_v12, %v607_v13 }
 0x413   :  { %v930_v15 = vpop.f32.mrf.mxu0 }
 0x414   :  { %v613_v16 = vmax.f32 %v608_v14, 0.0 }
 0x415   :  { %v610_v17 = vpop.f32.mrf.mxu0 }
 0x416   :  { %v614_v18 = vpack.c.bf16 %v613_v16, %v613_v16 }
 0x417   :  { %v931_v19 = vpop.f32.mrf.mxu0 }
 0x418   :  { %949 = vmatmul.mubr.bf16.vlgmr.msra.gmra.mxu1 %v614_v18 }
 0x4d8   :  { %v720_v20 = vpop.f32.mrf.mxu1 }
 0x4d9   :  { %v721_v21 = vadd.f32 %v789_v0, %v720_v20 }
 0x4da   :  { %v950_v22 = vpop.f32.mrf.mxu1 }
 0x4db   :  { %v798_v23 = vmul.f32 -1.442695, %v721_v21 }
 0x4dc   :  { %v723_v24 = vpop.f32.mrf.mxu1 }
 0x4dd   :  { %1002 = vpow2.f32 %v798_v23 }
 0x4de   :  { %v951_v25 = vpop.f32.mrf.mxu1 }
 0x4ea   :  { %v1003_v26 = vpop.eup %1002 }
 0x4eb   :  { %v729_v27 = vadd.f32 1.0, %v1003_v26 }
 0x4ed   :  { %1004 = vrcp.f32 %v729_v27 }
 0x4fa   :  { %v1005_v28 = vpop.eup %1004 }
 0x4fb   :  { %732 = vst.msk [vmem:[#allocation10] sm:$0xff] %vm118_vm1, %v1005_v28 }
 0x4fc   :  { %1097 = shalt.err (!%p1094_p10)
}
 0x4fd   :  { %742 = dma.vmem_to_hbm [thread:$0]  %s740_s11, 128, %s1357_s13, [#allocation4]  }
 0x4fe   :  { %1112 = dma.done.wait [#allocation4], 128  }
 0x4ff   :  { %1113 = vsyncadd [#allocation4], 4294967168 }
 0x500   :  { %746 = vsyncpa [#allocation3], 1 }
 0x501   :  { %747 = vsyncpa [#allocation6], 1 }
 0x502   :  { %748 = vsyncpa [#allocation9], 1 }
 0x503   :  { %749 = vsyncpa [#allocation4], 1 }

// kernel: tpu_custom_call.1
= control target key start
LH: loop header
LB: loop body
LE: loop exit
PB: predicated region body
PF: predicated region fallthrough
CT: control target
= control target key end

     0   :  { %18 = vsyncpa [#allocation3], 0  ;;  %s1344_s0 = inlined_call_operand.vmem [shape: f32[8,16], index: 0, kind: input, shape index: {}]   ;;  %s1345_s1 = inlined_call_operand.hbm [shape: bf16[16,128], index: 1, kind: input, shape index: {}]   ;;  %s1346_s2 = inlined_call_operand.vmem [shape: f32[1,128], index: 2, kind: input, shape index: {}]   ;;  %s1347_s3 = inlined_call_operand.vmem [shape: bf16[128,128], index: 3, kind: input, shape index: {}]   ;;  %s1348_s4 = inlined_call_operand.vmem [shape: f32[1,128], index: 4, kind: input, shape index: {}]   ;;  %s1349_s5 = inlined_call_operand.hbm [shape: bf16[128,128], index: 5, kind: input, shape index: {}]   ;;  %s1350_s6 = inlined_call_operand.vmem [shape: f32[1,128], index: 6, kind: input, shape index: {}]   ;;  %s1351_s7 = inlined_call_operand.hbm [shape: bf16[128,128], index: 7, kind: input, shape index: {}]   ;;  %s1352_s8 = inlined_call_operand.vmem [shape: f32[1,128], index: 8, kind: input, shape index: {}]   ;;  %s1353_s9 = inlined_call_operand.hbm [shape: bf16[128,128], index: 9, kind: input, shape index: {}]   ;;  %s1354_s10 = inlined_call_operand.vmem [shape: f32[1,128], index: 10, kind: input, shape index: {}]   ;;  %s1355_s11 = inlined_call_operand.vmem [shape: bf16[128,16], index: 11, kind: input, shape index: {}]   ;;  %s1356_s12 = inlined_call_operand.vmem [shape: f32[1,16], index: 12, kind: input, shape index: {}]   ;;  %s1357_s13 = inlined_call_operand.hbm [shape: f32[8,16], index: 13, kind: output, shape index: {}]  }
   0x1   :  { %19 = vsyncpa [#allocation6], 0 }
   0x2   :  { %20 = vsyncpa [#allocation9], 0 }
   0x3   :  { %21 = vsyncpa [#allocation4], 0  ;;  %s1114_s25 = smov [#allocation5]   ;;  %s1115_s27 = smov [#allocation2]  }
   0x4   :  { %s47_s26 = sshll.u32 %s1114_s25, 4  ;;  %s29_s28 = sshll.u32 %s1115_s27, 4  ;;  %s48_s26 = int_to_ptr.vmem [resolvable:$true] %s47_s26  ;;  %s30_s28 = int_to_ptr.vmem [resolvable:$true] %s29_s28 }
   0x5   :  { %s1014_s29 = scalar_lea.vmem %s48_s26, 1024  ;;  %p1019_p1 = scmp.lt.s32.totalorder %s48_s26, %s48_s26 }
   0x6   :  { %p1015_p0 = scmp.ne.s32.totalorder %s48_s26, %s1014_s29  ;;  %p1020_p2 = scmp.lt.s32.totalorder %s1014_s29, %s1014_s29 }
   0x8   :  { %p1021_p3 = por %p1020_p2, %p1019_p1 }
   0xa   :  { %p1022_p4 = pnand %p1021_p3, %p1015_p0 }
   0xc   :  { %1025 = shalt.err (!%p1022_p4)
}
   0xd   :  { %s1116_s30 = smov 64   ;;  %s1117_s14 = smov 4  }
   0xe   :  { %53 = dma.hbm_to_vmem [thread:$0]  %s1349_s5, 1024, %s48_s26, [#allocation6], %s1116_s30, %s1116_s30, %s1117_s14  }
   0xf   :  { %s1034_s17 = scalar_lea.vmem %s30_s28, 128  ;;  %p1039_p6 = scmp.lt.s32.totalorder %s30_s28, %s30_s28 }
  0x10   :  { %p1035_p5 = scmp.ne.s32.totalorder %s30_s28, %s1034_s17  ;;  %p1040_p7 = scmp.lt.s32.totalorder %s1034_s17, %s1034_s17 }
  0x12   :  { %p1041_p8 = por %p1040_p7, %p1039_p6 }
  0x14   :  { %p1042_p9 = pnand %p1041_p8, %p1035_p5 }
  0x16   :  { %1045 = shalt.err (!%p1042_p9)
}
  0x17   :  { %35 = dma.hbm_to_vmem [thread:$0]  %s1345_s1, 128, %s30_s28, [#allocation3], %s1116_s30, %s1116_s30, %s1117_s14  }
  0x18   :  { %s1118_s20 = smov [#allocation7]   ;;  %s1119_s22 = smov [#allocation8]  }
  0x19   :  { %s61_s21 = sshll.u32 %s1118_s20, 4  ;;  %s75_s23 = sshll.u32 %s1119_s22, 4  ;;  %s62_s21 = int_to_ptr.vmem [resolvable:$true] %s61_s21  ;;  %s76_s23 = int_to_ptr.vmem [resolvable:$true] %s75_s23 }
  0x1a   :  { %s1054_s5 = scalar_lea.vmem %s62_s21, 1024  ;;  %p1059_p11 = scmp.lt.s32.totalorder %s62_s21, %s62_s21 }
  0x1b   :  { %p1055_p10 = scmp.ne.s32.totalorder %s62_s21, %s1054_s5  ;;  %p1060_p12 = scmp.lt.s32.totalorder %s1054_s5, %s1054_s5 }
  0x1d   :  { %p1061_p13 = por %p1060_p12, %p1059_p11 }
  0x1f   :  { %p1062_p0 = pnand %p1061_p13, %p1055_p10 }
  0x21   :  { %1065 = shalt.err (!%p1062_p0)
}
  0x22   :  { %67 = dma.hbm_to_vmem [thread:$0]  %s1351_s7, 1024, %s62_s21, [#allocation6], %s1116_s30, %s1116_s30, %s1117_s14  }
  0x23   :  { %s1074_s1 = scalar_lea.vmem %s76_s23, 1024  ;;  %p1079_p2 = scmp.lt.s32.totalorder %s76_s23, %s76_s23 }
  0x24   :  { %p1075_p1 = scmp.ne.s32.totalorder %s76_s23, %s1074_s1  ;;  %p1080_p3 = scmp.lt.s32.totalorder %s1074_s1, %s1074_s1 }
  0x26   :  { %p1081_p4 = por %p1080_p3, %p1079_p2 }
  0x28   :  { %p1082_p5 = pnand %p1081_p4, %p1075_p1 }
  0x2a   :  { %1085 = shalt.err (!%p1082_p5)
}
  0x2b   :  { %81 = dma.hbm_to_vmem [thread:$0]  %s1353_s9, 1024, %s76_s23, [#allocation9], %s1116_s30, %s1116_s30, %s1117_s14  }
  0x2c   :  { %1106 = dma.done.wait [#allocation3], 128  }
  0x2d   :  { %1107 = vsyncadd [#allocation3], 4294967168 }
  0x2e   :  { %1108 = dma.done.wait [#allocation6], 2048  }
  0x2f   :  { %1109 = vsyncadd [#allocation6], 4294965248 }
  0x30   :  { %1110 = dma.done.wait [#allocation9], 1024  }
  0x31   :  { %1111 = vsyncadd [#allocation9], 4294966272  ;;  %v1120_v0 = vmov 0.0   ;;  %vm1121_vm0 = vmmov 0   ;;  %v961_v1 = vld [vmem:[#allocation2] sm:$0xff]   ;;  %vm118_vm1 = vcmask 130048  }
  0x32   :  { %846 = vmatprep.subr.bf16.mxu0 %v1120_v0  ;;  %848 = vmatprep.mubr.msk.bf16.mxu0 %vm1121_vm0, %v1120_v0  ;;  %v101_v2 = vld [vmem:[%s1344_s0] sm:$0xff]  ;;  %v962_v4 = vld [vmem:[%s1347_s3 + $0x38] sm:$0xff]   ;;  %v963_v5 = vld [vmem:[%s1347_s3 + $0x30] sm:$0xff]  }
  0x33   :  { %852 = vmatprep.subr.bf16.mxu1 %v1120_v0  ;;  %868 = vmatprep.mubr.msk.bf16.mxu1 %vm1121_vm0, %v1120_v0  ;;  %v102_v3 = vpack.c.bf16 %v101_v2, %v101_v2  ;;  %v964_v6 = vld [vmem:[%s1347_s3 + $0x28] sm:$0xff]   ;;  %v965_v7 = vld [vmem:[%s1347_s3 + $0x20] sm:$0xff]   ;;  %v966_v8 = vld [vmem:[%s1347_s3 + $0x18] sm:$0xff]  }
  0x34   :  { %847 = vmatpush3.bf16.msra.mxu0 %v961_v1  ;;  %853 = vmatpush3.bf16.msra.mxu1 %v962_v4  ;;  %v967_v9 = vld [vmem:[%s1347_s3 + $0x10] sm:$0xff]   ;;  %v968_v10 = vld [vmem:[%s1347_s3 + $0x8] sm:$0xff]   ;;  %v969_v11 = vld [vmem:[%s1347_s3] sm:$0xff]  }
  0x35   :  { %872 = vmatprep.subr.bf16.mxu0 %v1120_v0  ;;  %854 = vmatprep.subr.bf16.mxu1 %v1120_v0  ;;  %v970_v12 = vld [vmem:[#allocation5 + $0x38] sm:$0xff]   ;;  %v971_v13 = vld [vmem:[#allocation5 + $0x30] sm:$0xff]   ;;  %v972_v14 = vld [vmem:[#allocation5 + $0x28] sm:$0xff]  }
  0x36   :  { %v973_v15 = vld [vmem:[#allocation5 + $0x20] sm:$0xff]   ;;  %v974_v16 = vld [vmem:[#allocation5 + $0x18] sm:$0xff]   ;;  %v975_v17 = vld [vmem:[#allocation5 + $0x10] sm:$0xff]  }
  0x37   :  { %849 = vmatmul.mubr.msk.bf16.vlgmr.msra.gmra.mxu0 %vm118_vm1, %v102_v3  ;;  %v750_v18 = vld [vmem:[%s1346_s2] ss:$0 sm:$0xff]  ;;  %v976_v26 = vld [vmem:[#allocation5 + $0x8] sm:$0xff]   ;;  %v977_v27 = vld [vmem:[#allocation5] sm:$0xff]  }
  0x38   :  { %888 = vmatprep.mubr.msk.bf16.mxu0 %vm1121_vm0, %v1120_v0  ;;  %855 = vmatpush3.bf16.msra.mxu1 %v963_v5  ;;  %v978_v28 = vld [vmem:[#allocation7 + $0x38] sm:$0xff]   ;;  %v979_v29 = vld [vmem:[#allocation7 + $0x30] sm:$0xff]   ;;  %v980_v30 = vld [vmem:[#allocation7 + $0x28] sm:$0xff]  }
  0x39   :  { %856 = vmatprep.subr.bf16.mxu1 %v1120_v0  ;;  %873 = vmatpush3.bf16.msra.mxu0 %v970_v12  ;;  %v981_v31 = vld [vmem:[#allocation7 + $0x20] sm:$0xff]   ;;  %v982_v32 = vld [vmem:[#allocation7 + $0x18] sm:$0xff]   ;;  %v983_v33 = vld [vmem:[#allocation7 + $0x10] sm:$0xff]  }
  0x3a   :  { %874 = vmatprep.subr.bf16.mxu0 %v1120_v0  ;;  %v984_v34 = vld [vmem:[#allocation7 + $0x8] sm:$0xff]   ;;  %v753_v35 = vld [vmem:[%s1348_s4] ss:$0 sm:$0xff]  ;;  %v985_v43 = vld [vmem:[#allocation7] sm:$0xff]  }
  0x3b   :  { %v986_v44 = vld [vmem:[#allocation8 + $0x38] sm:$0xff]   ;;  %v987_v45 = vld [vmem:[#allocation8 + $0x30] sm:$0xff]   ;;  %v988_v46 = vld [vmem:[#allocation8 + $0x28] sm:$0xff]  }
  0x3c   :  { %857 = vmatpush3.bf16.msra.mxu1 %v964_v6  ;;  %v989_v47 = vld [vmem:[#allocation8 + $0x20] sm:$0xff]   ;;  %v990_v48 = vld [vmem:[#allocation8 + $0x18] sm:$0xff]   ;;  %v991_v49 = vld [vmem:[#allocation8 + $0x10] sm:$0xff]  }
  0x3d   :  { %858 = vmatprep.subr.bf16.mxu1 %v1120_v0  ;;  %875 = vmatpush3.bf16.msra.mxu0 %v971_v13  ;;  %v762_v50 = vld [vmem:[%s1350_s6] ss:$0 sm:$0xff]  ;;  %v992_v57 = vld [vmem:[#allocation8 + $0x8] sm:$0xff]   ;;  %v993_v58 = vld [vmem:[#allocation8] sm:$0xff]  }
  0x3e   :  { %876 = vmatprep.subr.bf16.mxu0 %v1120_v0  ;;  %v994_v59 = vld [vmem:[%s1355_s11 + $0x38] sm:$0xff]   ;;  %v995_v60 = vld [vmem:[%s1355_s11 + $0x30] sm:$0xff]   ;;  %v996_v61 = vld [vmem:[%s1355_s11 + $0x28] sm:$0xff]  }
  0x3f   :  { %v997_v62 = vld [vmem:[%s1355_s11 + $0x20] sm:$0xff]   ;;  %v998_v63 = vld [vmem:[%s1355_s11 + $0x18] sm:$0xff]   ;;  %v999_v1 = vld [vmem:[%s1355_s11 + $0x10] sm:$0xff]  }
  0x40   :  { %859 = vmatpush3.bf16.msra.mxu1 %v965_v7  ;;  %v771_v2 = vld [vmem:[%s1352_s8] ss:$0 sm:$0xff] }
  0x41   :  { %860 = vmatprep.subr.bf16.mxu1 %v1120_v0  ;;  %877 = vmatpush3.bf16.msra.mxu0 %v972_v14  ;;  %v780_v12 = vld [vmem:[%s1354_s10] ss:$0 sm:$0xff]  ;;  %s1122_s10 = smov [#allocation10]  }
  0x42   :  { %878 = vmatprep.subr.bf16.mxu0 %v1120_v0 }
  0x44   :  { %861 = vmatpush3.bf16.msra.mxu1 %v966_v8 }
  0x45   :  { %862 = vmatprep.subr.bf16.mxu1 %v1120_v0  ;;  %879 = vmatpush3.bf16.msra.mxu0 %v973_v15 }
  0x46   :  { %880 = vmatprep.subr.bf16.mxu0 %v1120_v0 }
  0x48   :  { %863 = vmatpush3.bf16.msra.mxu1 %v967_v9 }
  0x49   :  { %864 = vmatprep.subr.bf16.mxu1 %v1120_v0  ;;  %881 = vmatpush3.bf16.msra.mxu0 %v974_v16 }
  0x4a   :  { %882 = vmatprep.subr.bf16.mxu0 %v1120_v0 }
  0x4c   :  { %865 = vmatpush3.bf16.msra.mxu1 %v968_v10  ;;  %v1000_v10 = vld [vmem:[%s1355_s11 + $0x8] sm:$0xff]  }
  0x4d   :  { %866 = vmatprep.subr.bf16.mxu1 %v1120_v0  ;;  %883 = vmatpush3.bf16.msra.mxu0 %v975_v17 }
  0x4e   :  { %884 = vmatprep.subr.bf16.mxu0 %v1120_v0 }
  0x50   :  { %867 = vmatpush3.bf16.msra.mxu1 %v969_v11  ;;  %v1001_v11 = vld [vmem:[%s1355_s11] sm:$0xff]   ;;  %s739_s11 = sshll.u32 %s1122_s10, 4  ;;  %s740_s11 = int_to_ptr.vmem [resolvable:$true] %s739_s11 }
  0x51   :  { %892 = vmatprep.subr.bf16.mxu1 %v1120_v0  ;;  %885 = vmatpush3.bf16.msra.mxu0 %v976_v26  ;;  %s1086_s25 = scalar_lea.vmem %s740_s11, 128  ;;  %p1091_p7 = scmp.lt.s32.totalorder %s740_s11, %s740_s11 }
  0x52   :  { %886 = vmatprep.subr.bf16.mxu0 %v1120_v0  ;;  %p1087_p6 = scmp.ne.s32.totalorder %s740_s11, %s1086_s25  ;;  %p1092_p8 = scmp.lt.s32.totalorder %s1086_s25, %s1086_s25 }
  0x54   :  { %p1093_p9 = por %p1092_p8, %p1091_p7 }
  0x55   :  { %887 = vmatpush3.bf16.msra.mxu0 %v977_v27 }
  0x56   :  { %912 = vmatprep.subr.bf16.mxu0 %v1120_v0  ;;  %p1094_p10 = pnand %p1093_p9, %p1087_p6 }
  0xf7   :  { %v156_v19 = vpop.f32.mrf.mxu0 }
  0xf8   :  { %v157_v20 = vadd.f32 %v750_v18, %v156_v19 }
  0xf9   :  { %v850_v21 = vpop.f32.mrf.mxu0 }
  0xfa   :  { %v162_v22 = vmax.f32 %v157_v20, 0.0 }
  0xfb   :  { %v159_v23 = vpop.f32.mrf.mxu0 }
  0xfc   :  { %v163_v24 = vpack.c.bf16 %v162_v22, %v162_v22 }
  0xfd   :  { %v851_v25 = vpop.f32.mrf.mxu0 }
  0xfe   :  { %869 = vmatmul.mubr.bf16.vlgmr.msra.gmra.mxu1 %v163_v24 }
  0xff   :  { %908 = vmatprep.mubr.msk.bf16.mxu1 %vm1121_vm0, %v1120_v0  ;;  %893 = vmatpush3.bf16.msra.mxu1 %v978_v28 }
 0x100   :  { %894 = vmatprep.subr.bf16.mxu1 %v1120_v0 }
 0x103   :  { %895 = vmatpush3.bf16.msra.mxu1 %v979_v29 }
 0x104   :  { %896 = vmatprep.subr.bf16.mxu1 %v1120_v0 }
 0x107   :  { %897 = vmatpush3.bf16.msra.mxu1 %v980_v30 }
 0x108   :  { %898 = vmatprep.subr.bf16.mxu1 %v1120_v0 }
 0x10b   :  { %899 = vmatpush3.bf16.msra.mxu1 %v981_v31 }
 0x10c   :  { %900 = vmatprep.subr.bf16.mxu1 %v1120_v0 }
 0x10f   :  { %901 = vmatpush3.bf16.msra.mxu1 %v982_v32 }
 0x110   :  { %902 = vmatprep.subr.bf16.mxu1 %v1120_v0 }
 0x113   :  { %903 = vmatpush3.bf16.msra.mxu1 %v983_v33 }
 0x114   :  { %904 = vmatprep.subr.bf16.mxu1 %v1120_v0 }
 0x117   :  { %905 = vmatpush3.bf16.msra.mxu1 %v984_v34 }
 0x118   :  { %906 = vmatprep.subr.bf16.mxu1 %v1120_v0 }
 0x11b   :  { %907 = vmatpush3.bf16.msra.mxu1 %v985_v43 }
 0x11c   :  { %932 = vmatprep.subr.bf16.mxu1 %v1120_v0 }
 0x1be   :  { %v269_v36 = vpop.f32.mrf.mxu1 }
 0x1bf   :  { %v270_v37 = vadd.f32 %v753_v35, %v269_v36 }
 0x1c0   :  { %v870_v38 = vpop.f32.mrf.mxu1 }
 0x1c1   :  { %v275_v39 = vmax.f32 %v270_v37, 0.0 }
 0x1c2   :  { %v272_v40 = vpop.f32.mrf.mxu1 }
 0x1c3   :  { %v276_v41 = vpack.c.bf16 %v275_v39, %v275_v39 }
 0x1c4   :  { %v871_v42 = vpop.f32.mrf.mxu1 }
 0x1c5   :  { %889 = vmatmul.mubr.bf16.vlgmr.msra.gmra.mxu0 %v276_v41 }
 0x1c6   :  { %928 = vmatprep.mubr.msk.bf16.mxu0 %vm1121_vm0, %v1120_v0  ;;  %913 = vmatpush3.bf16.msra.mxu0 %v986_v44 }
 0x1c7   :  { %914 = vmatprep.subr.bf16.mxu0 %v1120_v0 }
 0x1ca   :  { %915 = vmatpush3.bf16.msra.mxu0 %v987_v45 }
 0x1cb   :  { %916 = vmatprep.subr.bf16.mxu0 %v1120_v0 }
 0x1ce   :  { %917 = vmatpush3.bf16.msra.mxu0 %v988_v46 }
 0x1cf   :  { %918 = vmatprep.subr.bf16.mxu0 %v1120_v0 }
 0x1d2   :  { %919 = vmatpush3.bf16.msra.mxu0 %v989_v47 }
 0x1d3   :  { %920 = vmatprep.subr.bf16.mxu0 %v1120_v0 }
 0x1d6   :  { %921 = vmatpush3.bf16.msra.mxu0 %v990_v48 }
 0x1d7   :  { %922 = vmatprep.subr.bf16.mxu0 %v1120_v0 }
 0x1da   :  { %923 = vmatpush3.bf16.msra.mxu0 %v991_v49 }
 0x1db   :  { %924 = vmatprep.subr.bf16.mxu0 %v1120_v0 }
 0x1de   :  { %925 = vmatpush3.bf16.msra.mxu0 %v992_v57 }
 0x1df   :  { %926 = vmatprep.subr.bf16.mxu0 %v1120_v0 }
 0x1e2   :  { %927 = vmatpush3.bf16.msra.mxu0 %v993_v58 }
 0x285   :  { %v382_v51 = vpop.f32.mrf.mxu0 }
 0x286   :  { %v383_v52 = vadd.f32 %v762_v50, %v382_v51 }
 0x287   :  { %v890_v53 = vpop.f32.mrf.mxu0 }
 0x288   :  { %v388_v54 = vpack.c.bf16 %v383_v52, %v383_v52 }
 0x289   :  { %v385_v55 = vpop.f32.mrf.mxu0 }
 0x28a   :  { %909 = vmatmul.mubr.bf16.vlgmr.msra.gmra.mxu1 %v388_v54 }
 0x28b   :  { %v891_v56 = vpop.f32.mrf.mxu0  ;;  %948 = vmatprep.mubr.msk.bf16.mxu1 %vm1121_vm0, %v1120_v0  ;;  %933 = vmatpush3.bf16.msra.mxu1 %v994_v59 }
 0x28c   :  { %934 = vmatprep.subr.bf16.mxu1 %v1120_v0 }
 0x28f   :  { %935 = vmatpush3.bf16.msra.mxu1 %v995_v60 }
 0x290   :  { %936 = vmatprep.subr.bf16.mxu1 %v1120_v0 }
 0x293   :  { %937 = vmatpush3.bf16.msra.mxu1 %v996_v61 }
 0x294   :  { %938 = vmatprep.subr.bf16.mxu1 %v1120_v0 }
 0x297   :  { %939 = vmatpush3.bf16.msra.mxu1 %v997_v62 }
 0x298   :  { %940 = vmatprep.subr.bf16.mxu1 %v1120_v0 }
 0x29b   :  { %941 = vmatpush3.bf16.msra.mxu1 %v998_v63 }
 0x29c   :  { %942 = vmatprep.subr.bf16.mxu1 %v1120_v0 }
 0x29f   :  { %943 = vmatpush3.bf16.msra.mxu1 %v999_v1 }
 0x2a0   :  { %944 = vmatprep.subr.bf16.mxu1 %v1120_v0 }
 0x2a3   :  { %945 = vmatpush3.bf16.msra.mxu1 %v1000_v10 }
 0x2a4   :  { %946 = vmatprep.subr.bf16.mxu1 %v1120_v0  ;;  %v789_v0 = vld [vmem:[%s1356_s12] ss:$0 sm:$0xff] }
 0x2a7   :  { %947 = vmatpush3.bf16.msra.mxu1 %v1001_v11 }
 0x34a   :  { %v494_v3 = vpop.f32.mrf.mxu1 }
 0x34b   :  { %v495_v4 = vadd.f32 %v771_v2, %v494_v3 }
 0x34c   :  { %v910_v5 = vpop.f32.mrf.mxu1 }
 0x34d   :  { %v500_v6 = vmax.f32 %v495_v4, 0.0 }
 0x34e   :  { %v497_v7 = vpop.f32.mrf.mxu1 }
 0x34f   :  { %v501_v8 = vpack.c.bf16 %v500_v6, %v500_v6 }
 0x350   :  { %v911_v9 = vpop.f32.mrf.mxu1 }
 0x351   :  { %929 = vmatmul.mubr.bf16.vlgmr.msra.gmra.mxu0 %v501_v8 }
 0x411   :  { %v607_v13 = vpop.f32.mrf.mxu0 }
 0x412   :  { %v608_v14 = vadd.f32 %v780_v12, %v607_v13 }
 0x413   :  { %v930_v15 = vpop.f32.mrf.mxu0 }
 0x414   :  { %v613_v16 = vmax.f32 %v608_v14, 0.0 }
 0x415   :  { %v610_v17 = vpop.f32.mrf.mxu0 }
 0x416   :  { %v614_v18 = vpack.c.bf16 %v613_v16, %v613_v16 }
 0x417   :  { %v931_v19 = vpop.f32.mrf.mxu0 }
 0x418   :  { %949 = vmatmul.mubr.bf16.vlgmr.msra.gmra.mxu1 %v614_v18 }
 0x4d8   :  { %v720_v20 = vpop.f32.mrf.mxu1 }
 0x4d9   :  { %v721_v21 = vadd.f32 %v789_v0, %v720_v20 }
 0x4da   :  { %v950_v22 = vpop.f32.mrf.mxu1 }
 0x4db   :  { %v798_v23 = vmul.f32 -1.442695, %v721_v21 }
 0x4dc   :  { %v723_v24 = vpop.f32.mrf.mxu1 }
 0x4dd   :  { %1002 = vpow2.f32 %v798_v23 }
 0x4de   :  { %v951_v25 = vpop.f32.mrf.mxu1 }
 0x4ea   :  { %v1003_v26 = vpop.eup %1002 }
 0x4eb   :  { %v729_v27 = vadd.f32 1.0, %v1003_v26 }
 0x4ed   :  { %1004 = vrcp.f32 %v729_v27 }
 0x4fa   :  { %v1005_v28 = vpop.eup %1004 }
 0x4fb   :  { %732 = vst.msk [vmem:[#allocation10] sm:$0xff] %vm118_vm1, %v1005_v28 }
 0x4fc   :  { %1097 = shalt.err (!%p1094_p10)
}
 0x4fd   :  { %742 = dma.vmem_to_hbm [thread:$0]  %s740_s11, 128, %s1357_s13, [#allocation4]  }
 0x4fe   :  { %1112 = dma.done.wait [#allocation4], 128  }
 0x4ff   :  { %1113 = vsyncadd [#allocation4], 4294967168 }
 0x500   :  { %746 = vsyncpa [#allocation3], 1 }
 0x501   :  { %747 = vsyncpa [#allocation6], 1 }
 0x502   :  { %748 = vsyncpa [#allocation9], 1 }
 0x503   :  { %749 = vsyncpa [#allocation4], 1 }

</bundles_post_ra>
